<compile_context>
chip_gen: v5e
topology: v5e:2x2
jax: 0.10.0
libtpu: 0.0.40
codegen_flags: <defaults>
</compile_context>

<pallas_src>
import functools

import jax
import jax.numpy as jnp
from jax.experimental import pallas as pl
from jax.experimental.pallas import tpu as pltpu


def _round_up(x, m):
    return -(-x // m) * m


def _shift_zero(v, d, axis):
    """out[i] = v[i - d] along `axis`, zero-filled where i - d is out of range."""
    n = v.shape[axis]
    if d == 0:
        return v
    if abs(d) >= n:
        return jnp.zeros_like(v)
    pad_shape = list(v.shape)
    pad_shape[axis] = abs(d)
    zeros = jnp.zeros(pad_shape, v.dtype)
    if d > 0:
        kept = jax.lax.slice_in_dim(v, 0, n - d, axis=axis)
        return jnp.concatenate((zeros, kept), axis=axis)
    kept = jax.lax.slice_in_dim(v, -d, n, axis=axis)
    return jnp.concatenate((kept, zeros), axis=axis)


def _neg_pow(t, beta):
    """t ** (-beta) with no vector divide; EUP-friendly special cases."""
    if beta == 0.75:                       # default: t^-3/4 = rsqrt(t) * sqrt(rsqrt(t))
        r = jax.lax.rsqrt(t)
        return r * jnp.sqrt(r)
    if beta == 0.5:
        return jax.lax.rsqrt(t)
    if beta == 1.0:
        return pl.reciprocal(t)
    return jnp.exp(-beta * jnp.log(t))     # general beta; requires t > 0 (k > 0)


# ---------------- 4-D path: cross-channel LRN on (N, C, H*W) ----------------
def _lrn_cross_channel_kernel(x_ref, o_ref, *, size, alpha, beta, k):
    x = x_ref[0].astype(jnp.float32)       # (C, T): channels on sublanes, pixels on lanes
    c = x.shape[0]
    half = (size - 1) // 2
    sq = x * x
    acc = sq                               # zero-padded window sum over channels
    for d in range(1, half + 1):
        if d < c:
            acc = acc + _shift_zero(sq, d, 0) + _shift_zero(sq, -d, 0)
    t = acc * (alpha / size) + k           # alpha * window_mean + k  (divisor = size)
    o_ref[0] = (x * _neg_pow(t, beta)).astype(o_ref.dtype)


def _pick_lane_tile(n, c, hw, itemsize, budget_bytes=1 << 20, max_lanes=2048):
    """Lane-dense (multiple-of-128) pixel-tile size, chosen from a VMEM byte budget."""
    if hw <= 128:
        return hw                          # one full-row block (block dim == array dim)
    t = (budget_bytes // (itemsize * max(c, 1))) // 128 * 128
    t = int(min(max(t, 128), max_lanes))
    t = min(t, _round_up(hw, 128))         # never wider than the (padded) row
    if n * pl.cdiv(hw, t) < 2:             # >= 2 grid steps for dual-TC (v7x)
        t = max(128, _round_up(pl.cdiv(hw, 2), 128))
    return t


def _lrn_nchw(x, size, alpha, beta, k):
    n, c, h, w = x.shape
    hw = h * w
    xr = x.reshape(n, c, hw)               # free view of the contiguous NCHW buffer
    t = _pick_lane_tile(n, c, hw, x.dtype.itemsize)
    grid = (n, pl.cdiv(hw, t))             # ragged last tile is masked by Pallas
    out = pl.pallas_call(
        functools.partial(_lrn_cross_channel_kernel,
                          size=size, alpha=alpha, beta=beta, k=k),
        out_shape=jax.ShapeDtypeStruct((n, c, hw), x.dtype),
        grid_spec=pltpu.PrefetchScalarGridSpec(
            num_scalar_prefetch=0,
            grid=grid,
            in_specs=[pl.BlockSpec((1, c, t), lambda i, j: (i, 0, j))],
            out_specs=pl.BlockSpec((1, c, t), lambda i, j: (i, 0, j))),
        compiler_params=pltpu.CompilerParams(
            dimension_semantics=("parallel", "parallel"),
            vmem_limit_bytes=32 * 1024 * 1024),
    )(xr)
    return out.reshape(n, c, h, w)


# ---------------- 3-D path: size x size spatial LRN per plane ----------------
def _lrn_spatial_kernel(x_ref, o_ref, *, size, alpha, beta, k):
    half = (size - 1) // 2
    p_planes, h, w = x_ref.shape

    @pl.loop(0, p_planes)                  # planes are independent; DMA moved them all
    def _(p):
        x = x_ref[p].astype(jnp.float32)   # (H, W) plane
        sq = x * x
        rows = sq                          # window sum along lanes (W)
        for d in range(1, half + 1):
            if d < w:
                rows = rows + _shift_zero(sq, d, 1) + _shift_zero(sq, -d, 1)
        acc = rows                         # then along sublanes (H)
        for d in range(1, half + 1):
            if d < h:
                acc = acc + _shift_zero(rows, d, 0) + _shift_zero(rows, -d, 0)
        t = acc * (alpha / (size * size)) + k
        o_ref[p] = (x * _neg_pow(t, beta)).astype(o_ref.dtype)


def _lrn_3d(x, size, alpha, beta, k, budget_bytes=1 << 20):
    d0, d1, d2 = x.shape
    # Lane density: put the longer spatial axis on lanes when W < 128 (the size x size
    # window and its padding are symmetric, so the plane transpose is exact).
    transposed = d2 < 128 and d1 > d2
    if transposed:
        x = jnp.swapaxes(x, 1, 2)
        d1, d2 = d2, d1
    # Batch planes per grid step so each DMA block is ~budget_bytes (VMEM-padded size).
    plane_bytes = x.dtype.itemsize * _round_up(d1, 8) * _round_up(d2, 128)
    p = max(1, min(d0, budget_bytes // plane_bytes))
    if d0 > 1 and pl.cdiv(d0, p) < 2:      # >= 2 grid steps for dual-TC (v7x)
        p = pl.cdiv(d0, 2)
    out = pl.pallas_call(
        functools.partial(_lrn_spatial_kernel,
                          size=size, alpha=alpha, beta=beta, k=k),
        out_shape=jax.ShapeDtypeStruct((d0, d1, d2), x.dtype),
        grid_spec=pltpu.PrefetchScalarGridSpec(
            num_scalar_prefetch=0,
            grid=(pl.cdiv(d0, p),),        # ragged last block of planes is masked
            in_specs=[pl.BlockSpec((p, d1, d2), lambda i: (i, 0, 0))],
            out_specs=pl.BlockSpec((p, d1, d2), lambda i: (i, 0, 0))),
        compiler_params=pltpu.CompilerParams(
            dimension_semantics=("parallel",),
            vmem_limit_bytes=32 * 1024 * 1024),
    )(x)
    if transposed:
        out = jnp.swapaxes(out, 1, 2)
    return out


def local_response_normalization(a, size=5, alpha=1e-4, beta=0.75, k=2.0):
    """Forward pass of the PyTorch LocalResponseNormalization module.

    4-D (N, C, H, W): div = AvgPool3d((size,1,1)) of a^2 (zero pad, divisor=size)
    3-D (P, H, W):    div = AvgPool2d(size)       of a^2 (zero pad, divisor=size^2)
    b = a / (alpha * div + k) ** beta
    (Exact for odd `size`; PyTorch's asymmetric even-size pooling window is not modeled.)
    """
    if a.ndim == 3:
        return _lrn_3d(a, size, alpha, beta, k)
    if a.ndim == 4:
        return _lrn_nchw(a, size, alpha, beta, k)
    # TODO(synk): 5-D inputs (AvgPool3d pooling over dim 2 of (N, C, D, H, W)) are
    # accepted by the PyTorch module but not implemented here.
    raise NotImplementedError("LRN Pallas kernel supports 3-D or 4-D inputs only.")


# ------------- pure-JAX reference (self-check in __main__, rigor only) -------------
def _lrn_reference(a, size=5, alpha=1e-4, beta=0.75, k=2.0):
    half = (size - 1) // 2
    sq = a * a
    zero = jnp.zeros((), sq.dtype)
    if a.ndim == 3:
        s = jax.lax.reduce_window(sq, zero, jax.lax.add, (1, size, size), (1, 1, 1),
                                  [(0, 0), (half, half), (half, half)])
        div = s / float(size * size)
    else:
        s = jax.lax.reduce_window(sq, zero, jax.lax.add, (1, size, 1, 1), (1, 1, 1, 1),
                                  [(0, 0), (half, half), (0, 0), (0, 0)])
        div = s / float(size)
    return a / (div * alpha + k) ** beta


if __name__ == "__main__":
    key = jax.random.PRNGKey(0)
    k4a, k4b, k3 = jax.random.split(key, 3)

    # 4-D NCHW (the AlexNet use case): one 128-aligned and one ragged H*W case.
    x4a = jax.random.normal(k4a, (2, 8, 16, 16), jnp.float32)    # hw = 256 (aligned)
    x4b = jax.random.normal(k4b, (1, 8, 12, 12), jnp.float32)    # hw = 144 (ragged tile)
    # 3-D input exercising the spatial-averaging branch (planes batched per block).
    x3 = jax.random.normal(k3, (4, 8, 128), jnp.float32)

    lrn = jax.jit(lambda a: local_response_normalization(
        a, size=5, alpha=1e-4, beta=0.75, k=2.0))

    y4a = lrn(x4a)
    y4b = lrn(x4b)
    y3 = lrn(x3)
    jax.block_until_ready((y4a, y4b, y3))

    for y, x in ((y4a, x4a), (y4b, x4b), (y3, x3)):
        assert y.shape == x.shape and y.dtype == x.dtype
        assert bool(jnp.all(jnp.isfinite(y)))
        r = _lrn_reference(x)
        assert bool(jnp.allclose(y, r, rtol=1e-5, atol=1e-6)), \
            float(jnp.max(jnp.abs(y - r)))
    print("KERNEL_OK")
</pallas_src>

<mosaic_0001>
module attributes {stable_mosaic.version = 11 : i64} {
  func.func @_lrn_cross_channel_kernel(%arg0: i32, %arg1: i32, %arg2: memref<1x8x256xf32, #tpu.memory_space<vmem>>, %arg3: memref<1x8x256xf32, #tpu.memory_space<vmem>>) attributes {dimension_semantics = [#tpu.dimension_semantics<parallel>, #tpu.dimension_semantics<parallel>], iteration_bounds = array<i64: 2, 1>, scalar_prefetch = 0 : i64, scratch_operands = 0 : i64, tpu.core_type = #tpu.core_type<tc>, window_params = [{transform_indices = @transform_0, window_bounds = array<i64: 1, 8, 256>}, {transform_indices = @transform_1, window_bounds = array<i64: 1, 8, 256>}]} {
    %c0 = arith.constant 0 : index
    %c0_0 = arith.constant 0 : index
    %c0_1 = arith.constant 0 : index
    %0 = vector.load %arg2[%c0, %c0_0, %c0_1] : memref<1x8x256xf32, #tpu.memory_space<vmem>>, vector<1x8x256xf32>
    %1 = vector.shape_cast %0 : vector<1x8x256xf32> to vector<8x256xf32>
    %2 = arith.mulf %1, %1 : vector<8x256xf32>
    %cst = arith.constant 0.000000e+00 : f32
    %3 = vector.broadcast %cst : f32 to vector<1x256xf32>
    %4 = vector.extract_strided_slice %2 {offsets = [0, 0], sizes = [7, 256], strides = [1, 1]} : vector<8x256xf32> to vector<7x256xf32>
    %5 = tpu.concatenate %3, %4 in 0 : vector<1x256xf32>, vector<7x256xf32> -> vector<8x256xf32>
    %6 = arith.addf %2, %5 : vector<8x256xf32>
    %cst_2 = arith.constant 0.000000e+00 : f32
    %7 = vector.broadcast %cst_2 : f32 to vector<1x256xf32>
    %8 = vector.extract_strided_slice %2 {offsets = [1, 0], sizes = [7, 256], strides = [1, 1]} : vector<8x256xf32> to vector<7x256xf32>
    %9 = tpu.concatenate %8, %7 in 0 : vector<7x256xf32>, vector<1x256xf32> -> vector<8x256xf32>
    %10 = arith.addf %6, %9 : vector<8x256xf32>
    %cst_3 = arith.constant 0.000000e+00 : f32
    %11 = vector.broadcast %cst_3 : f32 to vector<2x256xf32>
    %12 = vector.extract_strided_slice %2 {offsets = [0, 0], sizes = [6, 256], strides = [1, 1]} : vector<8x256xf32> to vector<6x256xf32>
    %13 = tpu.concatenate %11, %12 in 0 : vector<2x256xf32>, vector<6x256xf32> -> vector<8x256xf32>
    %14 = arith.addf %10, %13 : vector<8x256xf32>
    %cst_4 = arith.constant 0.000000e+00 : f32
    %15 = vector.broadcast %cst_4 : f32 to vector<2x256xf32>
    %16 = vector.extract_strided_slice %2 {offsets = [2, 0], sizes = [6, 256], strides = [1, 1]} : vector<8x256xf32> to vector<6x256xf32>
    %17 = tpu.concatenate %16, %15 in 0 : vector<6x256xf32>, vector<2x256xf32> -> vector<8x256xf32>
    %18 = arith.addf %14, %17 : vector<8x256xf32>
    %cst_5 = arith.constant 2.000000e-05 : f32
    %19 = vector.broadcast %cst_5 : f32 to vector<8x256xf32>
    %20 = arith.mulf %18, %19 : vector<8x256xf32>
    %cst_6 = arith.constant 2.000000e+00 : f32
    %21 = vector.broadcast %cst_6 : f32 to vector<8x256xf32>
    %22 = arith.addf %20, %21 : vector<8x256xf32>
    %23 = math.rsqrt %22 : vector<8x256xf32>
    %24 = math.sqrt %23 : vector<8x256xf32>
    %25 = arith.mulf %23, %24 : vector<8x256xf32>
    %26 = arith.mulf %1, %25 : vector<8x256xf32>
    %c0_7 = arith.constant 0 : index
    %c0_8 = arith.constant 0 : index
    %c0_9 = arith.constant 0 : index
    %27 = vector.load %arg3[%c0_7, %c0_8, %c0_9] : memref<1x8x256xf32, #tpu.memory_space<vmem>>, vector<1x8x256xf32>
    %28 = vector.shape_cast %27 : vector<1x8x256xf32> to vector<8x256xf32>
    %29 = vector.shape_cast %26 : vector<8x256xf32> to vector<1x8x256xf32>
    tpu.vector_store %arg3[%c0_7, %c0_8, %c0_9], %29 {strides = array<i32>} : memref<1x8x256xf32, #tpu.memory_space<vmem>>, vector<1x8x256xf32>,
    return
  }
  func.func @transform_0(%arg0: i32, %arg1: i32) -> (i32, i32, i32) {
    %c0_i32 = arith.constant 0 : i32
    %c0_i32_0 = arith.constant 0 : i32
    return %arg0, %c0_i32, %arg1 : i32, i32, i32
  }
  func.func @transform_1(%arg0: i32, %arg1: i32) -> (i32, i32, i32) {
    %c0_i32 = arith.constant 0 : i32
    %c0_i32_0 = arith.constant 0 : i32
    return %arg0, %c0_i32, %arg1 : i32, i32, i32
  }
}

</mosaic_0001>

<bundles_post_ra>
// kernel: _lambda_.1
= control target key start
LH: loop header
LB: loop body
LE: loop exit
PB: predicated region body
PF: predicated region fallthrough
CT: control target
= control target key end

     0   :  { %s418_s6 = smov 0   ;;  %s420_s7 = smov 0   ;;  %s468_s0 = inlined_call_operand.vmem [shape: f32[2,8,256], index: 0, kind: input, shape index: {}]   ;;  %s469_s1 = inlined_call_operand.vmem [shape: f32[2,8,256], index: 1, kind: output, shape index: {}]  }
   0x1   :  { %s422_s8 = smov 0  }
   0x2 LB: > { %s23_s9 = sadd.s32 1, %s402_s7  ;;  %p343_p0 = scmp.ge.s32.totalorder %s406_s8, 1  ;;  %s406_s8 = sphi %s422_s8, %s11_s8   ;;  %s402_s7 = sphi %s420_s7, %s471_s7   ;;  %s398_s6 = sphi %s418_s6, %s470_s6  }
   0x3   : > { %p25_p1 = scmp.ge.s32.totalorder %s23_s9, 2  ;;  %p108_p2 = scmp.lt.s32.totalorder %s406_s8, 3 }
   0x5   : > { %s473_s9 = smov (%p25_p1, %s23_s9), 0  ;;  %p109_p3 = pnand %p343_p0, %p108_p2 }
   0x6   : > { %p137_p4 = scmp.lt.s32.totalorder (!%p109_p3), %s398_s6, 1 }
   0x7   : > { %112 = sbr.rel (%p109_p3) target bundleno = 78 (0x4e), region = 24 }
   0xc   : > { %s475_s6 = smov (!%p137_p4, %s398_s6), 1  ;;  %vm166_vm0 = vcmask 1040384   ;;  %vm175_vm1 = vcmask 1046528   ;;  %vm184_vm2 = vcmask 1041408   ;;  %vm193_vm3 = vcmask 1045504  }
   0xd   : > { %s350_s10 = sshll.u32 %s475_s6, 4 }
   0xe   : > { %s144_s13 = scalar_lea.vmem %s468_s0, %s350_s10  ;;  %s154_s16 = scalar_lea.vmem %s469_s1, %s350_s10 }
   0xf   : > { %v444_v0 = vld [vmem:[%s144_s13] sm:$0xff]  ;;  %v446_v1 = vld [vmem:[%s144_s13 + $0x8] sm:$0xff] }
  0x10   : > { %v158_v2 = vmul.f32 %v444_v0, %v444_v0  ;;  %v159_v3 = vmul.f32 %v446_v1, %v446_v1 }
  0x12   : > { %v162_v4 = vrot.slane %v158_v2, 7  ;;  %v171_v5 = vrot.slane %v158_v2, 1  ;;  %v180_v6 = vrot.slane %v158_v2, 6  ;;  %v163_v7 = vrot.slane %v159_v3, 7 }
  0x13   : > { %v172_v8 = vrot.slane %v159_v3, 1  ;;  %v181_v9 = vrot.slane %v159_v3, 6  ;;  %v189_v12 = vrot.slane %v158_v2, 2  ;;  %v190_v16 = vrot.slane %v159_v3, 2 }
  0x14   : > { %v167_v10 = vsel %vm166_vm0, 0.0, %v162_v4  ;;  %v176_v11 = vsel %vm175_vm1, %v171_v5, 0.0  ;;  %v168_v14 = vsel %vm166_vm0, 0.0, %v163_v7  ;;  %v185_v17 = vsel %vm184_vm2, 0.0, %v180_v6 }
  0x15   : > { %v169_v13 = vadd.f32 %v167_v10, %v158_v2  ;;  %v177_v15 = vsel %vm175_vm1, %v172_v8, 0.0  ;;  %v170_v18 = vadd.f32 %v168_v14, %v159_v3  ;;  %v186_v20 = vsel %vm184_vm2, 0.0, %v181_v9 }
  0x16   : > { %v194_v21 = vsel %vm193_vm3, %v189_v12, 0.0  ;;  %v195_v24 = vsel %vm193_vm3, %v190_v16, 0.0 }
  0x17   : > { %v178_v19 = vadd.f32 %v176_v11, %v169_v13  ;;  %v179_v22 = vadd.f32 %v177_v15, %v170_v18 }
  0x19   : > { %v187_v23 = vadd.f32 %v185_v17, %v178_v19  ;;  %v188_v25 = vadd.f32 %v186_v20, %v179_v22 }
  0x1b   : > { %v196_v26 = vadd.f32 %v194_v21, %v187_v23  ;;  %v197_v27 = vadd.f32 %v195_v24, %v188_v25 }
  0x1d   : > { %v198_v28 = vmul.f32 2e-05, %v196_v26  ;;  %v199_v29 = vmul.f32 2e-05, %v197_v27 }
  0x1f   : > { %v200_v30 = vadd.f32 2.0, %v198_v28  ;;  %v201_v31 = vadd.f32 2.0, %v199_v29 }
  0x21   : > { %376 = vrsqrt.f32 %v200_v30  ;;  %vm208_vm4 = vweird.f32 %v200_v30  ;;  %vm218_vm6 = vweird.f32 %v201_v31 }
  0x22   : > { %378 = vrsqrt.f32 %v201_v31 }
  0x27   : > { %v377_v32 = vpop.eup %376 }
  0x28   : > { %v379_v33 = vpop.eup %378  ;;  %v203_v34 = vmul.f32 %v377_v32, %v200_v30  ;;  %vm209_vm5 = vweird.f32 %v377_v32 }
  0x29   : > { %v213_v35 = vmul.f32 %v379_v33, %v201_v31  ;;  %vm219_vm7 = vweird.f32 %v379_v33  ;;  %vm210_vm8 = vmor %vm208_vm4, %vm209_vm5 }
  0x2a   : > { %v204_v36 = vmul.f32 %v377_v32, %v203_v34  ;;  %vm220_vm9 = vmor %vm218_vm6, %vm219_vm7 }
  0x2b   : > { %v214_v37 = vmul.f32 %v379_v33, %v213_v35 }
  0x2c   : > { %v205_v38 = vmul.f32 0.5, %v204_v36 }
  0x2d   : > { %v215_v39 = vmul.f32 0.5, %v214_v37 }
  0x2e   : > { %v206_v40 = vsub.f32 1.5, %v205_v38 }
  0x2f   : > { %v216_v41 = vsub.f32 1.5, %v215_v39 }
  0x30   : > { %v207_v42 = vmul.f32 %v377_v32, %v206_v40 }
  0x31   : > { %v217_v43 = vmul.f32 %v379_v33, %v216_v41 }
  0x32   : > { %v211_v44 = vsel %vm210_vm8, %v377_v32, %v207_v42 }
  0x33   : > { %380 = vrsqrt.f32 %v211_v44  ;;  %v221_v45 = vsel %vm220_vm9, %v379_v33, %v217_v43  ;;  %vm229_vm10 = vcmp.eq.f32.partialorder %v211_v44, inf  ;;  %v232_v57 = vand.u32 2147483648, %v211_v44 }
  0x34   : > { %382 = vrsqrt.f32 %v221_v45  ;;  %vm231_vm11 = vcmp.eq.f32.partialorder %v211_v44, 0.0  ;;  %vm241_vm12 = vcmp.eq.f32.partialorder %v221_v45, inf  ;;  %v244_v60 = vand.u32 2147483648, %v221_v45 }
  0x35   : > { %vm243_vm13 = vcmp.eq.f32.partialorder %v221_v45, 0.0 }
  0x39   : > { %v381_v46 = vpop.eup %380 }
  0x3a   : > { %v223_v47 = vmul.f32 %v381_v46, %v211_v44  ;;  %v383_v48 = vpop.eup %382 }
  0x3b   : > { %v235_v50 = vmul.f32 %v383_v48, %v221_v45 }
  0x3c   : > { %v224_v49 = vmul.f32 %v381_v46, %v223_v47 }
  0x3d   : > { %v236_v52 = vmul.f32 %v383_v48, %v235_v50 }
  0x3e   : > { %v225_v51 = vmul.f32 0.5, %v224_v49 }
  0x3f   : > { %v237_v54 = vmul.f32 0.5, %v236_v52 }
  0x40   : > { %v226_v53 = vsub.f32 1.5, %v225_v51 }
  0x41   : > { %v238_v56 = vsub.f32 1.5, %v237_v54 }
  0x42   : > { %v227_v55 = vmul.f32 %v381_v46, %v226_v53 }
  0x43   : > { %v239_v59 = vmul.f32 %v383_v48, %v238_v56 }
  0x44   : > { %v228_v58 = vmul.f32 %v227_v55, %v211_v44 }
  0x45   : > { %v240_v62 = vmul.f32 %v239_v59, %v221_v45 }
  0x46   : > { %v230_v61 = vsel %vm229_vm10, %v211_v44, %v228_v58 }
  0x47   : > { %v233_v63 = vsel %vm231_vm11, %v232_v57, %v230_v61  ;;  %v242_v3 = vsel %vm241_vm12, %v221_v45, %v240_v62 }
  0x48   : > { %v246_v2 = vmul.f32 %v233_v63, %v211_v44  ;;  %v245_v4 = vsel %vm243_vm13, %v244_v60, %v242_v3 }
  0x49   : > { %v247_v6 = vmul.f32 %v245_v4, %v221_v45 }
  0x4a   : > { %v248_v5 = vmul.f32 %v246_v2, %v444_v0 }
  0x4b   : > { %v249_v7 = vmul.f32 %v247_v6, %v446_v1 }
  0x4c   : > { %250 = vst [vmem:[%s154_s16] sm:$0xff] %v248_v5 }
  0x4d   : > { %251 = vst [vmem:[%s154_s16 + $0x8] sm:$0xff] %v249_v7 }
  0x4e PF: > { %s11_s8 = sadd.s32 1, %s406_s8   ;;  %s470_s6 = smov %s402_s7 }
  0x4f   : > { %p8_p5 = scmp.ge.s32.totalorder %s11_s8, 4   ;;  %s471_s7 = smov %s473_s9 }
  0x51   :  { %10 = sbr.rel (!%p8_p5) target bundleno = 2 (0x2), region = 54 }

</bundles_post_ra>
